<compile_context>
chip_gen: v5e
topology: v5e:2x2
jax: 0.10.0
libtpu: 0.0.40
codegen_flags: <defaults>
</compile_context>

<pallas_src>
import math

import jax
import jax.numpy as jnp
import numpy as np
from jax.experimental import pallas as pl
from jax.experimental.pallas import tpu as pltpu


def _pick_row_tile(rows: int, lane_width: int, itemsize: int) -> int:
    """Row tile for the packed [rows, lane_width] problem.

    Targets x blocks of ~1-4 MiB (big enough to amortize per-grid-step pipeline overhead,
    small enough that double-buffered x+out plus the f32 angle temporary fit scoped VMEM
    on v5e/v6e and v7x's 64 MiB), keeps >=2 (ideally >=8) grid steps so DMA/compute overlap
    and 2-TensorCore sharding (v7x) stay alive, and keeps the tile a multiple of the packed
    sublane count for sub-32-bit dtypes.
    """
    min_tile = {4: 8, 2: 16, 1: 32}.get(itemsize, 8)
    max_block = 4 * 1024 * 1024
    cands = [t for t in (8192, 4096, 2048, 1024, 512, 256, 128, 64, 32, 16, 8)
             if t >= min_tile and t * lane_width * itemsize <= max_block]
    if not cands:
        cands = [min_tile]

    def steps(t):
        return -(-rows // t)

    # Smallest tile with a >= 1 MiB block and >= 8 grid steps (4 per TC on 2-TC chips).
    for t in reversed(cands):
        if t * lane_width * itemsize >= (1 << 20) and steps(t) >= 8:
            return t
    # Otherwise the largest tile that still leaves >= 2 grid steps (keeps double buffering).
    for t in cands:
        if steps(t) >= 2:
            return t
    # Tiny problem: smallest tile that covers all rows in one step (minimal padding).
    covering = [t for t in cands if t >= rows]
    return covering[-1] if covering else cands[0]


def _build_pe_weight(d_model: int, group: int, k_pad: int) -> jnp.ndarray:
    """Constant (k_pad, group*d_model) matrix W such that, with
         p_row = [p0_g0..p0_g{G-1}, p1_g0..p1_g{G-1}, 1, 0, ...],
       (p_row @ W)[lane] = angle + phase for that lane and pe = sin(p_row @ W)."""
    lane_width = group * d_model
    lanes = np.arange(lane_width)
    g = lanes // d_model                      # which packed sub-row this lane belongs to
    d = lanes % d_model                       # embedding index within that sub-row
    freq = np.exp((d // 4) * 4 * (-math.log(10000.0) / d_model))   # div_term_10000
    is_coord1 = (d % 4) >= 2                  # lanes 2,3 (mod 4) use positions[..., 1]
    phase = np.where(d % 2 == 1, np.pi / 2.0, 0.0)                 # cos == sin(. + pi/2)

    w = np.zeros((k_pad, lane_width), np.float32)
    w[g, lanes] = np.where(is_coord1, 0.0, freq)          # coord-0 rows carry the frequency
    w[group + g, lanes] = np.where(is_coord1, 1.0, 0.0)   # coord-1 rows carry 1 (div_term_1)
    w[2 * group, :] = phase                                # constant-1 column -> phase
    return jnp.asarray(w)


def _pe_add_kernel(x_ref, p_ref, w_ref, o_ref):
    # Tiny-K f32 matmul on the otherwise-idle MXU.  HIGHEST precision keeps true f32
    # (default precision could demote operands to bf16 and corrupt the angles).
    theta = jnp.dot(p_ref[...], w_ref[...],
                    precision=jax.lax.Precision.HIGHEST,
                    preferred_element_type=jnp.float32)
    o_ref[...] = (x_ref[...].astype(jnp.float32) + jnp.sin(theta)).astype(o_ref.dtype)


def two_dim_positional_encoding(x: jnp.ndarray, positions: jnp.ndarray,
                                *, donate_x: bool = False) -> jnp.ndarray:
    """x: [B, S, D]; positions: [B, S, 2].  Returns x + pe(positions)[:, :, :D]."""
    B, S, D = x.shape
    assert positions.shape == (B, S, 2)
    rows_total = B * S
    itemsize = jnp.dtype(x.dtype).itemsize

    # Lane-dense packing for every D: fold `group` consecutive (b, s) rows into the lane
    # axis so the last block dim is lcm(D, 128) -- always a multiple of 128.
    group = 128 // math.gcd(D, 128)
    lane_width = group * D
    rows = -(-rows_total // group)

    tile_rows = _pick_row_tile(rows, lane_width, itemsize)
    rows_padded = -(-rows // tile_rows) * tile_rows
    grid = (rows_padded // tile_rows,)

    # K = 2*group position columns + 1 constant column (carries the phase row of W).
    k = 2 * group + 1
    k_pad = -(-k // 8) * 8
    w = _build_pe_weight(D, group, k_pad)

    # Pack x: [B, S, D] -> [rows_padded, lane_width] (zero-padded tail rows, discarded later).
    x_flat = x.reshape(rows_total, D)
    x_flat = jnp.pad(x_flat, ((0, rows * group - rows_total), (0, 0)))
    x_packed = x_flat.reshape(rows, lane_width)
    x_packed = jnp.pad(x_packed, ((0, rows_padded - rows), (0, 0)))

    # Pack positions into one narrow (rows_padded, k_pad) f32 input.
    pos_flat = positions.reshape(rows_total, 2).astype(jnp.float32)
    pos_flat = jnp.pad(pos_flat, ((0, rows * group - rows_total), (0, 0)))
    p01 = pos_flat.reshape(rows, group, 2)
    p_merged = jnp.concatenate(
        [p01[:, :, 0], p01[:, :, 1],
         jnp.ones((rows, 1), jnp.float32),
         jnp.zeros((rows, k_pad - k), jnp.float32)], axis=1)
    p_merged = jnp.pad(p_merged, ((0, rows_padded - rows), (0, 0)))

    # Only raise the scoped-VMEM limit when the blocks actually need more than the most
    # conservative default (16 MiB on v5e); stays well under v7x's 64 MiB physical VMEM.
    x_block = tile_rows * lane_width * itemsize
    f32_block = tile_rows * lane_width * 4
    vmem_need = 4 * x_block + 2 * f32_block + 2 * (k_pad * lane_width * 4) + (2 << 20)
    compiler_kwargs = {"dimension_semantics": ("parallel",)}
    if vmem_need > 16 * 1024 * 1024:
        compiler_kwargs["vmem_limit_bytes"] = int(min(vmem_need, 48 * 1024 * 1024))

    out = pl.pallas_call(
        _pe_add_kernel,
        out_shape=jax.ShapeDtypeStruct((rows_padded, lane_width), x.dtype),
        grid_spec=pltpu.PrefetchScalarGridSpec(
            num_scalar_prefetch=0,
            grid=grid,
            in_specs=[
                pl.BlockSpec((tile_rows, lane_width), lambda i: (i, 0)),  # x rows
                pl.BlockSpec((tile_rows, k_pad), lambda i: (i, 0)),       # packed positions
                pl.BlockSpec((k_pad, lane_width), lambda i: (0, 0)),      # constant W (resident)
            ],
            out_specs=pl.BlockSpec((tile_rows, lane_width), lambda i: (i, 0)),
        ),
        compiler_params=pltpu.CompilerParams(**compiler_kwargs),
        input_output_aliases=({0: 0} if donate_x else {}),   # in-place add when x is donated
        # TODO(synk): the only change that removes the full HBM read+write pass is fusing
        # this add into the adjacent producer/consumer kernel.
    )(x_packed, p_merged, w)

    return out.reshape(rows_padded * group, D)[:rows_total].reshape(B, S, D)


def _reference(x: jnp.ndarray, positions: jnp.ndarray) -> jnp.ndarray:
    """Plain-JAX port of the PyTorch forward."""
    B, S, D = x.shape
    d_ceil = math.ceil(D / 4) * 4
    div_10000 = jnp.exp(jnp.arange(0, D, 4, dtype=jnp.float32) * (-math.log(10000.0) / D))
    div_1 = jnp.exp(jnp.arange(0, D, 4, dtype=jnp.float32) * (-math.log(1.0) / D))
    p0 = positions[:, :, 0:1].astype(jnp.float32)
    p1 = positions[:, :, 1:2].astype(jnp.float32)
    pe = jnp.zeros((B, S, d_ceil), jnp.float32)
    pe = pe.at[:, :, 0::4].set(jnp.sin(p0 * div_10000))
    pe = pe.at[:, :, 1::4].set(jnp.cos(p0 * div_10000))
    pe = pe.at[:, :, 2::4].set(jnp.sin(p1 * div_1))
    pe = pe.at[:, :, 3::4].set(jnp.cos(p1 * div_1))
    return (x.astype(jnp.float32) + pe[:, :, :D]).astype(x.dtype)


if __name__ == "__main__":
    key = jax.random.PRNGKey(0)
    k1, k2, k3, k4 = jax.random.split(key, 4)

    # Case 1: module default max_len == 32, D multiple of 32 -> group=4 lane packing.
    B, S, D = 2, 32, 32
    x = jax.random.normal(k1, (B, S, D), dtype=jnp.float32)
    positions = jax.random.randint(k2, (B, S, 2), 0, S).astype(jnp.float32)
    out = jax.block_until_ready(two_dim_positional_encoding(x, positions))
    assert out.shape == (B, S, D)
    assert bool(jnp.allclose(out, _reference(x, positions), atol=1e-4, rtol=1e-4)), \
        "mismatch vs reference (case 1)"

    # Case 2: D not a multiple of 4 -> exercises the generalized lane packing (group=64,
    # lane_width=1152) and the row-padding path.
    B2, S2, D2 = 2, 8, 18
    x2 = jax.random.normal(k3, (B2, S2, D2), dtype=jnp.float32)
    positions2 = jax.random.randint(k4, (B2, S2, 2), 0, S2).astype(jnp.float32)
    out2 = jax.block_until_ready(two_dim_positional_encoding(x2, positions2))
    assert out2.shape == (B2, S2, D2)
    assert bool(jnp.allclose(out2, _reference(x2, positions2), atol=1e-4, rtol=1e-4)), \
        "mismatch vs reference (case 2)"

    print("KERNEL_OK")
</pallas_src>

<mosaic_0001>
module attributes {stable_mosaic.version = 11 : i64} {
  func.func @_pe_add_kernel(%arg0: i32, %arg1: memref<8x128xf32, #tpu.memory_space<vmem>>, %arg2: memref<8x16xf32, #tpu.memory_space<vmem>>, %arg3: memref<16x128xf32, #tpu.memory_space<vmem>>, %arg4: memref<8x128xf32, #tpu.memory_space<vmem>>) attributes {dimension_semantics = [#tpu.dimension_semantics<parallel>], iteration_bounds = array<i64: 2>, scalar_prefetch = 0 : i64, scratch_operands = 0 : i64, tpu.core_type = #tpu.core_type<tc>, window_params = [{transform_indices = @transform_0, window_bounds = array<i64: 8, 128>}, {transform_indices = @transform_1, window_bounds = array<i64: 8, 16>}, {pipeline_mode = #tpu.pipeline_mode<synchronous>, transform_indices = @transform_2, window_bounds = array<i64: 16, 128>}, {transform_indices = @transform_3, window_bounds = array<i64: 8, 128>}]} {
    %c0 = arith.constant 0 : index
    %c0_0 = arith.constant 0 : index
    %0 = vector.load %arg2[%c0, %c0_0] : memref<8x16xf32, #tpu.memory_space<vmem>>, vector<8x16xf32>
    %c0_1 = arith.constant 0 : index
    %c0_2 = arith.constant 0 : index
    %1 = vector.load %arg3[%c0_1, %c0_2] : memref<16x128xf32, #tpu.memory_space<vmem>>, vector<16x128xf32>
    %cst = arith.constant dense<0.000000e+00> : vector<8x128xf32>
    %2 = tpu.matmul %0, %1, %cst {dimension_numbers = #tpu.dot_dimension_numbers<[1], [0], [0], [1], [0, 0, 1, 1], [], []>, precision = #tpu.contract_precision<fp32>} : vector<8x16xf32>, vector<16x128xf32>, vector<8x128xf32> -> vector<8x128xf32>
    %c0_3 = arith.constant 0 : index
    %c0_4 = arith.constant 0 : index
    %3 = vector.load %arg1[%c0_3, %c0_4] : memref<8x128xf32, #tpu.memory_space<vmem>>, vector<8x128xf32>
    %4 = math.sin %2 : vector<8x128xf32>
    %5 = arith.addf %3, %4 : vector<8x128xf32>
    %c0_5 = arith.constant 0 : index
    %c0_6 = arith.constant 0 : index
    %6 = vector.load %arg4[%c0_5, %c0_6] : memref<8x128xf32, #tpu.memory_space<vmem>>, vector<8x128xf32>
    tpu.vector_store %arg4[%c0_5, %c0_6], %5 {strides = array<i32>} : memref<8x128xf32, #tpu.memory_space<vmem>>, vector<8x128xf32>,
    return
  }
  func.func @transform_0(%arg0: i32) -> (i32, i32) {
    %c0_i32 = arith.constant 0 : i32
    %c0_i32_0 = arith.constant 0 : i32
    return %arg0, %c0_i32 : i32, i32
  }
  func.func @transform_1(%arg0: i32) -> (i32, i32) {
    %c0_i32 = arith.constant 0 : i32
    %c0_i32_0 = arith.constant 0 : i32
    return %arg0, %c0_i32 : i32, i32
  }
  func.func @transform_2(%arg0: i32) -> (i32, i32) {
    %c0_i32 = arith.constant 0 : i32
    %c0_i32_0 = arith.constant 0 : i32
    %c0_i32_1 = arith.constant 0 : i32
    return %c0_i32, %c0_i32_0 : i32, i32
  }
  func.func @transform_3(%arg0: i32) -> (i32, i32) {
    %c0_i32 = arith.constant 0 : i32
    %c0_i32_0 = arith.constant 0 : i32
    return %arg0, %c0_i32 : i32, i32
  }
}

</mosaic_0001>

<bundles_post_ra>
// kernel: tpu_custom_call.1
= control target key start
LH: loop header
LB: loop body
LE: loop exit
PB: predicated region body
PF: predicated region fallthrough
CT: control target
= control target key end

     0   :  { %s1200_s0 = inlined_call_operand.hbm [shape: f32[16,128], index: 0, kind: input, shape index: {}]   ;;  %s1201_s1 = inlined_call_operand.hbm [shape: f32[16,16], index: 1, kind: input, shape index: {}]   ;;  %s1202_s2 = inlined_call_operand.hbm [shape: f32[16,128], index: 2, kind: input, shape index: {}]   ;;  %s1203_s3 = inlined_call_operand.hbm [shape: f32[16,128], index: 3, kind: output, shape index: {}]  }
   0x1   :  { %1204 = sst [smem:[#allocation14_spill]] %s1202_s2 }
   0x2   :  { %8 = vsyncpa [#allocation3], 0 }
   0x3   :  { %10 = vsyncpa [#allocation3 + $0x1], 0 }
   0x4   :  { %11 = vsyncpa [#allocation6], 0 }
   0x5   :  { %13 = vsyncpa [#allocation6 + $0x1], 0 }
   0x6   :  { %14 = vsyncpa [#allocation4], 0 }
   0x7   :  { %16 = vsyncpa [#allocation4 + $0x1], 0  ;;  %s972_s12 = smov 0   ;;  %s974_s13 = smov 0  }
   0x8   :  { %s976_s14 = smov 0   ;;  %s978_s15 = smov 0  }
   0x9 LB: > { %s1205_s2 = sld [smem:[#allocation14_spill]]  ;;  %s996_s19 = sadd.s32 4294967295, %s940_s15   ;;  %s940_s15 = sphi %s978_s15, %s1218_s15   ;;  %s936_s14 = sphi %s976_s14, %s1217_s14   ;;  %s932_s13 = sphi %s974_s13, %s1216_s13   ;;  %s928_s12 = sphi %s972_s12, %s1215_s12  }
   0xa   : > { %p686_p0 = scmp.ge.s32.totalorder %s940_s15, 1  ;;  %p43_p1 = scmp.eq.s32.totalorder %s996_s19, 0 }
   0xb   : > { %p126_p2 = scmp.lt.s32.totalorder %s940_s15, 3  ;;  %s942_s21 = smov [#allocation7]  }
   0xc   : > { %s139_s22 = sshll.u32 %s942_s21, 4  ;;  %s943_s23 = smov 128   ;;  %s140_s22 = int_to_ptr.vmem [resolvable:$true] %s139_s22 }
   0xd   : > { %p1001_p3 = pnand %p686_p0, %p126_p2  ;;  %s944_s24 = smov 8  }
   0xe   : > { %s685_s25 = sadd.s32 4294967294, %s940_s15   ;;  %s1012_s26 = sadd.s32 1, %s940_s15  }
   0xf   : > { %s137_s18 = sshll.u32 %s1205_s2, 4  ;;  %p715_p4 = pneg %p1001_p3  ;;  %s138_s18 = int_to_ptr.hbm [resolvable:$true] %s137_s18 }
  0x10   : > { %s29_s27 = sadd.s32 1, %s936_s14  ;;  %s26_s28 = ssub.s32 %s940_s15, %s1012_s26 }
  0x11   : > { %p716_p6 = pnand %p715_p4, %p43_p1  ;;  %p36_p7 = scmp.ne.s32.totalorder %s936_s14, %s932_s13 }
  0x12   : > { %p27_p8 = scmp.eq.s32.totalorder %s26_s28, 0  ;;  %p37_p9 = scmp.eq.s32.totalorder %s940_s15, 0 }
  0x13   : > { %718 = dma.hbm_to_vmem [thread:$0]  (!%p716_p6), %s138_s18, 256, %s140_s22, [#allocation6], %s943_s23, %s943_s23, %s944_s24  }
  0x14   : > { %p42_p10 = scmp.ne.s32.totalorder %s932_s13, %s928_s12  ;;  %p113_p11 = scmp.eq.s32.totalorder %s996_s19, 1 }
  0x15   : > { %s1024_s29 = scalar_select %p27_p8, %s936_s14, %s29_s27  }
  0x16   : > { %p1026_p12 = por %p37_p9, %p36_p7  ;;  %p1032_p13 = por %p43_p1, %p42_p10 }
  0x17   : > { %1207 = sst [smem:[#allocation13_spill]] %s1024_s29  ;;  %p1036_p0 = por %p113_p11, %p36_p7 }
  0x18   : > { %p119_p2 = scmp.eq.s32.totalorder %s685_s25, 1  ;;  %p731_p4 = scmp.lt.s32.totalorder %s940_s15, 2 }
  0x19   : > { %s153_s6 = sand.u32 1, %s936_s14   ;;  %s690_s9 = sshll.u32 %s940_s15, 3 }
  0x1a   : > { %p1042_p6 = por %p119_p2, %p42_p10  ;;  %s689_s8 = sshll.u32 %s153_s6, 3 }
  0x1b   : > { %s161_s16 = scalar_lea.hbm %s1200_s0, %s690_s9  ;;  %s157_s18 = scalar_lea.vmem [#allocation2], %s689_s8 }
  0x1c   : > { %s163_s17 = sshll.u32 %s161_s16, 4  ;;  %s165_s21 = sshll.u32 %s157_s18, 4  ;;  %s164_s17 = int_to_ptr.hbm [resolvable:$true] %s163_s17  ;;  %s166_s21 = int_to_ptr.vmem [resolvable:$true] %s165_s21 }
  0x1d   : > { %p1052_p7 = pnand %p731_p4, %p1026_p12  ;;  %s180_s25 = scalar_lea.hbm %s1201_s1, %s690_s9 }
  0x1e   : > { %s172_s27 = sand.u32 1, %s940_s15   ;;  %s154_s28 = scalar_lea.sflag [#allocation3], %s153_s6 }
  0x1f   : > { %s806_s10 = sshra.s32 %s164_s17, 4  ;;  %p810_p9 = pneg %p1052_p7  ;;  %s807_s10 = int_to_ptr.hbm [resolvable:$true] %s806_s10 }
  0x20   : > { %s808_s11 = scalar_lea.hbm %s807_s10, 8  ;;  %s813_s18 = scalar_lea.hbm %s1200_s0, 16 }
  0x21   : > { %p809_p8 = scmp.ne.s32.totalorder %s807_s10, %s808_s11  ;;  %p814_p12 = scmp.lt.s32.totalorder %s807_s10, %s1200_s0 }
  0x22   : > { %p815_p2 = scmp.lt.s32.totalorder %s813_s18, %s808_s11 }
  0x23   : > { %p811_p10 = pnand %p810_p9, %p809_p8 }
  0x24   : > { %p816_p4 = por %p815_p2, %p814_p12 }
  0x25   : > { %p812_p11 = pneg %p811_p10 }
  0x27   : > { %p817_p5 = pnand %p816_p4, %p812_p11 }
  0x29   : > { %820 = shalt.err (!%p817_p5)
}
  0x2a   : > { %722 = dma.hbm_to_vmem [thread:$0]  (!%p1052_p7), %s164_s17, 128, %s166_s21, %s154_s28  }
  0x2b   : > { %s182_s6 = sshll.u32 %s180_s25, 4  ;;  %s176_s9 = scalar_lea.vmem [#allocation5], %s689_s8  ;;  %s183_s6 = int_to_ptr.hbm [resolvable:$true] %s182_s6 }
  0x2c   : > { %s184_s2 = sshll.u32 %s176_s9, 4  ;;  %s173_s29 = scalar_lea.sflag [#allocation6], %s172_s27  ;;  %s185_s2 = int_to_ptr.vmem [resolvable:$true] %s184_s2 }
  0x2d   : > { %s836_s30 = sshra.s32 %s183_s6, 4  ;;  %s843_s18 = scalar_lea.hbm %s1201_s1, 16  ;;  %s837_s30 = int_to_ptr.hbm [resolvable:$true] %s836_s30 }
  0x2e   : > { %s838_s16 = scalar_lea.hbm %s837_s30, 8  ;;  %p844_p5 = scmp.lt.s32.totalorder %s837_s30, %s1201_s1 }
  0x2f   : > { %p839_p8 = scmp.ne.s32.totalorder %s837_s30, %s838_s16  ;;  %p845_p11 = scmp.lt.s32.totalorder %s843_s18, %s838_s16 }
  0x31   : > { %p841_p10 = pnand %p839_p8, %p810_p9  ;;  %p846_p2 = por %p845_p11, %p844_p5 }
  0x33   : > { %p842_p12 = pneg %p841_p10 }
  0x35   : > { %p847_p4 = pnand %p846_p2, %p842_p12 }
  0x37   : > { %850 = shalt.err (!%p847_p4)
}
  0x38   : > { %725 = dma.hbm_to_vmem [thread:$0]  (!%p1052_p7), %s183_s6, 128, %s185_s2, %s173_s29  }
  0x39   : > { %193 = sbr.rel (%p1001_p3) target bundleno = 320 (0x140), region = 32  ;;  %s1087_s8 = sand.u32 (!%p1001_p3), 1, %s932_s13  }
  0x3a   : > { %s1090_s21 = sshll.u32 (!%p1001_p3), %s1087_s8, 3  ;;  %s196_s25 = scalar_lea.sflag (!%p1001_p3), [#allocation3], %s1087_s8 }
  0x3b   : > { %s199_s27 = scalar_lea.vmem (!%p1001_p3), [#allocation2], %s1090_s21 }
  0x3e   : > { %911 = dma.done.wait (%p1032_p13), %s196_s25, 128  }
  0x3f   : > { %913 = vsyncadd (%p1032_p13), %s196_s25, 4294967168  ;;  %s205_s2 = sand.u32 1, %s996_s19   ;;  %s209_s29 = scalar_lea.vmem [#allocation5], %s1090_s21 }
  0x40   : > { %s206_s20 = scalar_lea.sflag [#allocation6], %s205_s2 }
  0x41   : > { %915 = dma.done.wait (%p1032_p13), %s206_s20, 128  }
  0x42   : > { %917 = vsyncadd (%p1032_p13), %s206_s20, 4294967168 }
  0x43   : > { %919 = dma.done.wait (%p43_p1), [#allocation6], 256  }
  0x44   : > { %921 = vsyncadd (%p43_p1), [#allocation6], 4294967040  ;;  %vm246_vm0 = vcmask 130048   ;;  %v245_v0 = vld [vmem:[#allocation7 + $0x8] sm:$0xff]  ;;  %v244_v1 = vld [vmem:[#allocation7] sm:$0xff]  ;;  %s702_s4 = sshll.u32 %s996_s19, 3 }
  0x45   : > { %v243_v2 = vld [vmem:[%s209_s29] sm:$0xff]  ;;  %v264_v3 = vand.u32 4294901760, %v245_v0  ;;  %v266_v4 = vand.u32 4294901760, %v244_v1  ;;  %v945_v41 = vmov 683565275   ;;  %s578_s24 = scalar_lea.hbm %s1203_s3, %s702_s4  ;;  %s242_s6 = scalar_lea.vmem [#allocation8], %s1090_s21 }
  0x46   : > { %v248_v5 = vsel %vm246_vm0, %v243_v2, 0  ;;  %v946_v43 = vmov 2475754826   ;;  %v947_v46 = vmov 2131351028   ;;  %s580_s9 = sshll.u32 %s242_s6, 4  ;;  %s581_s9 = int_to_ptr.vmem [resolvable:$true] %s580_s9 }
  0x47   : > { %v268_v6 = vand.u32 4294901760, %v248_v5  ;;  %v292_v7 = vsub.f32 %v245_v0, %v264_v3  ;;  %265 = vmatpush.msra.mxu0 %v264_v3  ;;  %v298_v8 = vsub.f32 %v244_v1, %v266_v4  ;;  %349 = vmatpush.msra.mxu3 %v264_v3  ;;  %v948_v49 = vmov 2102212464   ;;  %s582_s19 = sshll.u32 %s578_s24, 4  ;;  %s568_s30 = scalar_lea.sflag [#allocation4], %s1087_s8  ;;  %s583_s19 = int_to_ptr.hbm [resolvable:$true] %s582_s19 }
  0x48   : > { %v949_v52 = vmov 920167782   ;;  %v950_v55 = vmov 1326507024   ;;  %s880_s16 = sshra.s32 %s583_s19, 4  ;;  %s886_s23 = scalar_lea.hbm %s1203_s3, 16  ;;  %s881_s16 = int_to_ptr.hbm [resolvable:$true] %s880_s16 }
  0x49   : > { %v269_v9 = vsub.f32 %v248_v5, %v268_v6  ;;  %324 = vmatpush.msra.mxu2 %v292_v7  ;;  %267 = vmatpush.msra.mxu0 %v266_v4  ;;  %v293_v10 = vand.u32 4294901760, %v292_v7  ;;  %v299_v11 = vand.u32 4294901760, %v298_v8  ;;  %s882_s10 = scalar_lea.hbm %s881_s16, 8  ;;  %p887_p7 = scmp.lt.s32.totalorder %s881_s16, %s1203_s3 }
  0x4a   : > { %351 = vmatpush.msra.mxu3 %v266_v4  ;;  %p883_p1 = scmp.ne.s32.totalorder %s881_s16, %s882_s10  ;;  %p888_p9 = scmp.lt.s32.totalorder %s886_s23, %s882_s10 }
  0x4b   : > { %v270_v12 = vand.u32 4294901760, %v269_v9  ;;  %327 = vmatpush.msra.mxu2 %v298_v8  ;;  %v294_v13 = vsub.f32 %v292_v7, %v293_v10  ;;  %376 = vmatpush.msrb.mxu0 %v293_v10  ;;  %v300_v14 = vsub.f32 %v298_v8, %v299_v11 }
  0x4c   : > { %330 = vmatmul.f32.vlgmr.msra.gmra.mxu2 %v269_v9  ;;  %p884_p3 = pnand %p883_p1, %p1036_p0  ;;  %p889_p8 = por %p888_p9, %p887_p7 }
  0x4d   : > { %v271_v15 = vsub.f32 %v269_v9, %v270_v12  ;;  %355 = vmatmul.f32.vlgmr.msra.gmra.mxu3 %v270_v12  ;;  %v295_v16 = vand.u32 4294901760, %v294_v13  ;;  %v301_v17 = vand.u32 4294901760, %v300_v14  ;;  %380 = vmatpush.msrb.mxu0 %v299_v11 }
  0x4e   : > { %p885_p13 = pneg %p884_p3 }
  0x4f   : > { %v272_v18 = vand.u32 4294901760, %v271_v15  ;;  %296 = vmatpush.msra.mxu1 %v295_v16 }
  0x50   : > { %p890_p10 = pnand %p889_p8, %p885_p13 }
  0x51   : > { %273 = vmatmul.f32.vlgmr.msra.gmra.mxu0 %v272_v18  ;;  %302 = vmatpush.msra.mxu1 %v301_v17 }
  0x52   : > { %304 = vmatmul.f32.vlgmr.msra.gmra.mxu1 %v268_v6 }
  0x53   : > { %401 = vmatpush.msrb.mxu1 %v264_v3 }
  0x55   : > { %403 = vmatpush.msrb.mxu1 %v266_v4 }
  0x59   : > { %382 = vmatmul.f32.vlgmr.msrb.gmra.mxu0 %v268_v6 }
  0x5a   : > { %405 = vmatmul.f32.vlgmr.msrb.gmra.mxu1 %v268_v6 }
  0xce   : > { %v274_v19 = vpop.f32.mrf.mxu0 }
  0xcf   : > { %v305_v20 = vpop.f32.mrf.mxu1  ;;  %v331_v21 = vpop.f32.mrf.mxu2 }
  0xd0   : > { %v306_v22 = vadd.f32 %v305_v20, %v274_v19  ;;  %v356_v23 = vpop.f32.mrf.mxu3 }
  0xd2   : > { %v332_v24 = vadd.f32 %v331_v21, %v306_v22 }
  0xd4   : > { %v357_v25 = vadd.f32 %v356_v23, %v332_v24 }
  0xd6   : > { %v383_v26 = vpop.f32.mrf.mxu0 }
  0xd7   : > { %v384_v27 = vadd.f32 %v383_v26, %v357_v25  ;;  %v406_v28 = vpop.f32.mrf.mxu1  ;;  %v951_v25 = vmov 0  }
  0xd9   : > { %v1108_v29 = vadd.f32 %v406_v28, %v384_v27 }
  0xdb   : > { %v413_v30 = vand.u32 2139095040, %v1108_v29  ;;  %v410_v33 = vand.u32 2147483647, %v1108_v29  ;;  %vm412_vm13 = vcmp.lt.s32.totalorder %v1108_v29, 0 }
  0xdd   : > { %v414_v31 = vshrl.u32 %v413_v30, 23  ;;  %v417_v35 = vand.u32 8388607, %v410_v33  ;;  %vm411_vm14 = vcmp.le.f32.partialorder %v410_v33, 0.7853982 }
  0xdf   : > { %v698_v32 = vadd.s32 4294967169, %v414_v31  ;;  %v418_v39 = vor.u32 8388608, %v417_v35 }
  0xe1   : > { %v420_v34 = vadd.s32 1, %v698_v32  ;;  %v1125_v62 = vshll.u32 %v418_v39, 8 }
  0xe3   : > { %vm421_vm1 = vcmp.gt.s32.totalorder %v420_v34, 0  ;;  %v459_v7 = vand.u32 65535, %v1125_v62  ;;  %v460_v8 = vshrl.u32 %v1125_v62, 16 }
  0xe4   : > { %v422_v36 = vsel %vm421_vm1, %v420_v34, 0 }
  0xe5   : > { %v424_v37 = vand.u32 31, %v422_v36  ;;  %v1116_v40 = vshrl.u32 %v422_v36, 5 }
  0xe7   : > { %v1114_v38 = vsub.s32 32, %v424_v37  ;;  %v427_v42 = vshll.u32 %v945_v41, %v424_v37  ;;  %v430_v44 = vshll.u32 %v946_v43, %v424_v37  ;;  %v433_v48 = vshll.u32 %v947_v46, %v424_v37 }
  0xe8   : > { %v436_v51 = vshll.u32 %v948_v49, %v424_v37  ;;  %v439_v54 = vshll.u32 %v949_v52, %v424_v37  ;;  %vm442_vm2 = vcmp.lt.s32.totalorder %v1116_v40, 1  ;;  %vm445_vm3 = vcmp.lt.s32.totalorder %v1116_v40, 4 }
  0xe9   : > { %v428_v45 = vshrl.u32 %v946_v43, %v1114_v38  ;;  %v431_v47 = vshrl.u32 %v947_v46, %v1114_v38  ;;  %v434_v50 = vshrl.u32 %v948_v49, %v1114_v38  ;;  %v437_v53 = vshrl.u32 %v949_v52, %v1114_v38 }
  0xea   : > { %v440_v56 = vshrl.u32 %v950_v55, %v1114_v38  ;;  %vm444_vm4 = vcmp.lt.s32.totalorder %v1116_v40, 3  ;;  %vm443_vm5 = vcmp.lt.s32.totalorder %v1116_v40, 2  ;;  %v426_v36 = vshrl.u32 %v945_v41, %v1114_v38 }
  0xeb   : > { %v429_v57 = vor.u32 %v428_v45, %v427_v42  ;;  %v432_v58 = vor.u32 %v431_v47, %v430_v44  ;;  %v435_v59 = vor.u32 %v434_v50, %v433_v48  ;;  %v438_v60 = vor.u32 %v437_v53, %v436_v51 }
  0xec   : > { %v441_v61 = vor.u32 %v440_v56, %v439_v54 }
  0xed   : > { %v450_v63 = vsel %vm442_vm2, %v429_v57, %v432_v58  ;;  %v454_v0 = vsel %vm442_vm2, %v432_v58, %v435_v59  ;;  %v451_v1 = vsel %vm445_vm3, %v438_v60, 920167782  ;;  %v447_v32 = vsel %vm445_vm3, %v435_v59, 2102212464 }
  0xee   : > { %v455_v2 = vsel %vm445_vm3, %v441_v61, 1326507024  ;;  %v452_v3 = vsel %vm444_vm4, %v435_v59, %v451_v1  ;;  %v446_v45 = vsel %vm442_vm2, %v426_v36, %v429_v57  ;;  %v448_v46 = vsel %vm444_vm4, %v432_v58, %v447_v32 }
  0xef   : > { %v456_v4 = vsel %vm444_vm4, %v438_v60, %v455_v2  ;;  %v453_v5 = vsel %vm443_vm5, %v450_v63, %v452_v3  ;;  %v449_v38 = vsel %vm443_vm5, %v446_v45, %v448_v46  ;;  %vm553_vm2 = vweird.f32 %v1108_v29 }
  0xf0   : > { %v457_v6 = vsel %vm443_vm5, %v454_v0, %v456_v4  ;;  %v483_v11 = vand.u32 65535, %v453_v5  ;;  %v484_v12 = vshrl.u32 %v453_v5, 16  ;;  %v503_v54 = vmul.u32 %v1125_v62, %v449_v38 }
  0xf1   : > { %v461_v9 = vand.u32 65535, %v457_v6  ;;  %v462_v10 = vshrl.u32 %v457_v6, 16 }
  0xf2   : > { %v486_v15 = vmul.u32 %v484_v12, %v459_v7  ;;  %v487_v16 = vmul.u32 %v483_v11, %v460_v8  ;;  %v485_v20 = vmul.u32 %v483_v11, %v459_v7  ;;  %v488_v24 = vmul.u32 %v484_v12, %v460_v8 }
  0xf3   : > { %v464_v13 = vmul.u32 %v462_v10, %v459_v7  ;;  %v465_v14 = vmul.u32 %v461_v9, %v460_v8  ;;  %v463_v17 = vmul.u32 %v461_v9, %v459_v7  ;;  %v466_v19 = vmul.u32 %v462_v10, %v460_v8 }
  0xf4   : > { %v489_v21 = vshll.u32 %v486_v15, 16  ;;  %v491_v27 = vshll.u32 %v487_v16, 16  ;;  %v490_v43 = vshrl.u32 %v486_v15, 16  ;;  %v492_v49 = vshrl.u32 %v487_v16, 16 }
  0xf5   : > { %v467_v18 = vshll.u32 %v464_v13, 16  ;;  %v469_v22 = vshll.u32 %v465_v14, 16  ;;  %v468_v37 = vshrl.u32 %v464_v13, 16  ;;  %v470_v47 = vshrl.u32 %v465_v14, 16 }
  0xf6   : > { %vm493_vm7 = vc.u32 %v485_v20, %v489_v21  ;;  %v495_v28 = vadd.s32 %v489_v21, %v485_v20 }
  0xf7   : > { %vm471_vm6 = vc.u32 %v463_v17, %v467_v18  ;;  %v473_v23 = vadd.s32 %v467_v18, %v463_v17  ;;  %v494_v31 = vsel %vm493_vm7, 1, %v951_v25 }
  0xf8   : > { %v472_v26 = vsel %vm471_vm6, 1, %v951_v25  ;;  %v496_v35 = vadd.s32 %v494_v31, %v488_v24  ;;  %vm497_vm9 = vc.u32 %v495_v28, %v491_v27  ;;  %v499_v52 = vadd.s32 %v495_v28, %v491_v27 }
  0xf9   : > { %v474_v30 = vadd.s32 %v472_v26, %v466_v19  ;;  %vm475_vm8 = vc.u32 %v473_v23, %v469_v22  ;;  %v498_v42 = vsel %vm497_vm9, 1, %v951_v25 }
  0xfa   : > { %v476_v34 = vsel %vm475_vm8, 1, %v951_v25  ;;  %v500_v44 = vadd.s32 %v498_v42, %v496_v35 }
  0xfb   : > { %v478_v39 = vadd.s32 %v476_v34, %v474_v30 }
  0xfc   : > { %v501_v50 = vadd.s32 %v500_v44, %v490_v43 }
  0xfd   : > { %v479_v48 = vadd.s32 %v478_v39, %v468_v37  ;;  %v409_v39 = vld [vmem:[%s199_s27] sm:$0xff] }
  0xfe   : > { %v502_v41 = vadd.s32 %v501_v50, %v492_v49 }
  0xff   : > { %v480_v51 = vadd.s32 %v479_v48, %v470_v47 }
 0x100   : > { %v506_v53 = vadd.s32 1, %v502_v41 }
 0x101   : > { %vm505_vm10 = vc.u32 %v480_v51, %v499_v52  ;;  %v504_v40 = vadd.s32 %v499_v52, %v480_v51 }
 0x102   : > { %v507_v55 = vsel %vm505_vm10, %v506_v53, %v502_v41 }
 0x103   : > { %v508_v56 = vadd.s32 %v507_v55, %v503_v54 }
 0x105   : > { %v509_v57 = vadd.s32 536870912, %v508_v56 }
 0x107   : > { %v510_v59 = vshrl.u32 %v509_v57, 30 }
 0x109   : > { %v511_v60 = vshll.u32 %v510_v59, 30  ;;  %v534_v15 = vsub.s32 4, %v510_v59 }
 0x10b   : > { %v512_v58 = vsub.s32 %v508_v56, %v511_v60  ;;  %v535_v20 = vsel %vm412_vm13, %v534_v15, %v510_v59 }
 0x10c   : > { %v537_v23 = vsel %vm411_vm14, 0, %v535_v20 }
 0x10d   : > { %vm513_vm11 = vcmp.lt.s32.totalorder %v512_v58, 0  ;;  %v514_v61 = vsub.s32 0, %v512_v58  ;;  %v554_v28 = vadd.s32 3, %v537_v23 }
 0x10f   : > { %v515_v63 = vsel %vm513_vm11, %v514_v61, %v512_v58  ;;  %v555_v34 = vand.u32 3, %v554_v28 }
 0x110   : > { %v516_v0 = vclz %v515_v63 }
 0x111   : > { %vm557_vm15 = vcmp.eq.s32.totalorder %v555_v34, 0  ;;  %vm560_vm0 = vcmp.eq.s32.totalorder %v555_v34, 2  ;;  %vm556_vm1 = vcmp.lt.s32.totalorder %v555_v34, 2 }
 0x112   : > { %v699_v1 = vadd.s32 4294967294, %v516_v0 }
 0x114   : > { %vm700_vm12 = vcmp.lt.s32.totalorder %v699_v1, 0 }
 0x115   : > { %v519_v2 = vsel %vm700_vm12, 0, %v699_v1 }
 0x116   : > { %v520_v3 = vsub.s32 32, %v519_v2  ;;  %v524_v4 = vsub.s32 4294967266, %v519_v2  ;;  %v521_v5 = vshll.u32 %v512_v58, %v519_v2 }
 0x118   : > { %v522_v6 = vshrl.u32 %v504_v40, %v520_v3  ;;  %v525_v7 = vadd.s32 127, %v524_v4 }
 0x11a   : > { %v523_v62 = vor.u32 %v522_v6, %v521_v5  ;;  %v526_v8 = vshll.u32 %v525_v7, 23 }
 0x11c   : > { %v527_v9 = vor.u32 4788187, %v526_v8  ;;  %v530_v11 = vcvt.s32.f32 %v523_v62 }
 0x11e   : > { %v528_v10 = vand.u32 2147483647, %v527_v9 }
 0x120   : > { %v531_v12 = vmul.f32 %v530_v11, %v528_v10 }
 0x122   : > { %v532_v13 = vxor.u32 2147483648, %v531_v12 }
 0x124   : > { %v533_v14 = vsel %vm412_vm13, %v532_v13, %v531_v12 }
 0x125   : > { %v536_v16 = vsel %vm411_vm14, %v1108_v29, %v533_v14 }
 0x126   : > { %v538_v17 = vmul.f32 %v536_v16, %v536_v16 }
 0x128   : > { %v546_v18 = vmul.f32 -0.00019511016, %v538_v17  ;;  %v539_v19 = vmul.f32 -0.001358992, %v538_v17 }
 0x12a   : > { %v547_v21 = vadd.f32 0.008332121, %v546_v18  ;;  %v540_v22 = vadd.f32 0.041655596, %v539_v19 }
 0x12c   : > { %v548_v24 = vmul.f32 %v547_v21, %v538_v17  ;;  %v541_v25 = vmul.f32 %v540_v22, %v538_v17 }
 0x12e   : > { %v549_v26 = vadd.f32 -0.16666654, %v548_v24  ;;  %v542_v27 = vadd.f32 -0.4999988, %v541_v25 }
 0x130   : > { %v550_v30 = vmul.f32 %v549_v26, %v538_v17  ;;  %v543_v33 = vmul.f32 %v542_v27, %v538_v17 }
 0x132   : > { %v551_v31 = vadd.f32 1.0, %v550_v30  ;;  %v544_v32 = vadd.f32 1.0, %v543_v33 }
 0x134   : > { %v552_v35 = vmul.f32 %v551_v31, %v536_v16  ;;  %v561_v36 = vxor.u32 2147483648, %v544_v32 }
 0x136   : > { %v558_v37 = vxor.u32 2147483648, %v552_v35  ;;  %v562_v43 = vsel %vm560_vm0, %v561_v36, %v552_v35 }
 0x138   : > { %v559_v42 = vsel %vm557_vm15, %v544_v32, %v558_v37 }
 0x139   : > { %v563_v44 = vsel %vm556_vm1, %v559_v42, %v562_v43 }
 0x13a   : > { %v564_v45 = vsel %vm553_vm2, nan, %v563_v44 }
 0x13b   : > { %v565_v46 = vadd.f32 %v564_v45, %v409_v39 }
 0x13d   : > { %566 = vst [vmem:[%s242_s6] sm:$0xff] %v565_v46 }
 0x13e   : > { %893 = shalt.err (!%p890_p10)
}
 0x13f   : > { %713 = dma.vmem_to_hbm [thread:$0]  (%p1036_p0), %s581_s9, 128, %s583_s19, %s568_s30  }
 0x140 PF: > { %s594_s8 = sand.u32 1, %s928_s12   ;;  %p1213_p12 = scmp.ge.s32.totalorder %s940_s15, 2 }
 0x141   : > { %s595_s25 = scalar_lea.sflag [#allocation4], %s594_s8 }
 0x142   : > { %p727_p5 = pnand %p1213_p12, %p1042_p6 }
 0x144   : > { %p728_p11 = pneg %p727_p5 }
 0x146   : > { %923 = dma.done.wait (%p728_p11), %s595_s25, 128  }
 0x147   : > { %925 = vsyncadd (%p728_p11), %s595_s25, 4294967168  ;;  %s1214_s27 = sld [smem:[#allocation13_spill]]  ;;  %p19_p2 = scmp.ge.s32.totalorder %s1012_s26, 4  }
 0x148   : > { %s1215_s12 = smov %s932_s13  ;;  %s1216_s13 = smov %s936_s14 }
 0x149   : > { %s1218_s15 = smov %s1012_s26  ;;  %21 = sbr.rel (!%p19_p2) target bundleno = 9 (0x9), region = 94 }
 0x14d   : > { %s1217_s14 = smov %s1214_s27 }
 0x14e   :  { %601 = vsyncpa [#allocation3], 1 }
 0x14f   :  { %603 = vsyncpa [#allocation3 + $0x1], 1 }
 0x150   :  { %604 = vsyncpa [#allocation6], 1 }
 0x151   :  { %606 = vsyncpa [#allocation6 + $0x1], 1 }
 0x152   :  { %607 = vsyncpa [#allocation4], 1 }
 0x153   :  { %609 = vsyncpa [#allocation4 + $0x1], 1 }

</bundles_post_ra>
